<compile_context>
chip_gen: v7x
topology: tpu7x:2x2x1
jax: 0.10.0
libtpu: 0.0.40
codegen_flags: <defaults>
</compile_context>

<pallas_src>
import numpy as np
import jax
import jax.numpy as jnp
from jax import lax
from jax.experimental import pallas as pl
from jax.experimental.pallas import tpu as pltpu

# ---------------------------------------------------------------------------
# Problem configuration (spatial_dims=2, kernel_size=3, stride=1, norm=instance,
# act=leakyrelu(0.01), bias=False — UnetBasicBlock defaults; dropout=None).
# ---------------------------------------------------------------------------
N, CIN, H, W = 2, 4, 16, 16
COUT = 8
K = 3
PAD = 1            # get_padding(3, 1) == 1
EPS = 1e-5         # nn.InstanceNorm2d default eps (affine=False by default)
NEG_SLOPE = 0.01   # leakyrelu negative_slope

HW = H * W         # 256  (multiple of 128 -> lane-dense)
CP = 8             # channels zero-padded 4 -> 8 so all sublane concats are aligned
KKCP = K * K * CP  # 72

# tap offsets (dh, dw) in kh-major, kw-minor order — must match the weight reshape below
_TAPS = [(kh - PAD, kw - PAD) for kh in range(K) for kw in range(K)]


def unet_block_kernel(x_ref, w_ref, mask_ref, o_ref):
    # x_ref   : (CP, HW)          f32   one sample, channel-padded, lane-dense
    # w_ref   : (2, COUT, KKCP)   bf16  [conv1, conv2] weights, pre-reshaped in the wrapper
    # mask_ref: (KKCP, HW)        f32   {0,1} per-tap border-validity mask
    # o_ref   : (COUT, HW)        f32   one sample of the output

    mask = mask_ref[...]                      # loaded once, reused by both convs

    def conv(a, w_bf16):
        # roll+mask im2col on the flattened (row, col) lane axis, then ONE MXU matmul
        # (COUT, KKCP) x (KKCP, HW) with bf16 operands and f32 accumulation.
        taps = []
        for dh, dw in _TAPS:
            s = dh * W + dw
            taps.append(a if s == 0 else pltpu.roll(a, (-s) % HW, 1))
        patches = jnp.concatenate(taps, axis=0)            # (KKCP, HW), aligned 8-row pieces
        patches = (patches * mask).astype(jnp.bfloat16)    # mask in f32, cast for the MXU
        return jnp.dot(w_bf16, patches, preferred_element_type=jnp.float32)

    def norm_act(y):
        # Instance norm (per channel over HW, biased variance) + LeakyReLU(0.01).
        # One cross-lane reduction for both sum and sum-of-squares (stack along sublanes).
        both = jnp.concatenate([y, y * y], axis=0)          # (2*COUT, HW)
        s = jnp.sum(both, axis=1, keepdims=True)            # (2*COUT, 1)
        mean = s[:COUT] * (1.0 / HW)
        var = s[COUT:] * (1.0 / HW) - mean * mean
        z = (y - mean) * lax.rsqrt(var + EPS)
        return jnp.where(z >= 0, z, NEG_SLOPE * z)

    a1 = norm_act(conv(x_ref[...], w_ref[0]))               # (COUT, HW); COUT == CP
    o_ref[...] = norm_act(conv(a1, w_ref[1])).astype(o_ref.dtype)


def _prep_weight(w, cin):
    """(K, K, cin, COUT) -> (COUT, KKCP) bf16, zero-padding cin up to CP (done in wrapper)."""
    w = w.astype(jnp.float32)
    if cin < CP:
        w = jnp.pad(w, ((0, 0), (0, 0), (0, CP - cin), (0, 0)))
    # flatten (kh, kw, c) -> row index (kh*K + kw)*CP + c, matching _TAPS / im2col ordering
    return w.reshape(KKCP, COUT).T.astype(jnp.bfloat16)


def _make_tap_mask():
    """(KKCP, HW) f32 {0,1}: per-tap in-image validity, replicated over the CP channel rows."""
    hh = np.arange(HW) // W
    ww = np.arange(HW) % W
    rows = []
    for dh, dw in _TAPS:
        valid = ((hh + dh >= 0) & (hh + dh < H) &
                 (ww + dw >= 0) & (ww + dw < W)).astype(np.float32)
        rows.append(np.broadcast_to(valid[None, :], (CP, HW)))
    return jnp.asarray(np.concatenate(rows, axis=0))


def unet_basic_block(x_nchw, w1, w2):
    """x_nchw: (N, CIN, H, W); w1: (3,3,CIN,COUT); w2: (3,3,COUT,COUT) -> (N, COUT, H, W)."""
    # NCHW handed in directly: reshape only (no transpose), plus a tiny zero channel-pad.
    x = x_nchw.astype(jnp.float32).reshape(N, CIN, HW)
    x = jnp.pad(x, ((0, 0), (0, CP - CIN), (0, 0)))                     # (N, CP, HW)

    w = jnp.stack([_prep_weight(w1, CIN), _prep_weight(w2, COUT)], 0)   # (2, COUT, KKCP) bf16
    mask = _make_tap_mask()                                             # (KKCP, HW) f32

    out = pl.pallas_call(
        unet_block_kernel,
        out_shape=jax.ShapeDtypeStruct((N, COUT, HW), jnp.float32),
        grid_spec=pltpu.PrefetchScalarGridSpec(
            num_scalar_prefetch=0,
            grid=(N,),                                    # one sample per program
            in_specs=[
                pl.BlockSpec((None, CP, HW), lambda n: (n, 0, 0)),
                pl.BlockSpec((2, COUT, KKCP), lambda n: (0, 0, 0)),
                pl.BlockSpec((KKCP, HW), lambda n: (0, 0)),
            ],
            out_specs=pl.BlockSpec((None, COUT, HW), lambda n: (n, 0, 0)),
        ),
        compiler_params=pltpu.CompilerParams(
            dimension_semantics=("parallel",)),           # megacore: split samples across TCs
    )(x, w, mask)

    return out.reshape(N, COUT, H, W)


# ---------------------------------------------------------------------------
# Pure-JAX reference (f32, for a correctness sanity check)
# ---------------------------------------------------------------------------
def _ref_forward(x_nchw, w1, w2):
    x = jnp.transpose(x_nchw, (0, 2, 3, 1)).astype(jnp.float32)
    dn = ('NHWC', 'HWIO', 'NHWC')

    def conv(x, w):
        return lax.conv_general_dilated(x, w, window_strides=(1, 1),
                                        padding=((PAD, PAD), (PAD, PAD)),
                                        dimension_numbers=dn,
                                        precision=lax.Precision.HIGHEST)

    def inorm(y):
        m = jnp.mean(y, axis=(1, 2), keepdims=True)
        v = jnp.mean((y - m) ** 2, axis=(1, 2), keepdims=True)
        return (y - m) * lax.rsqrt(v + EPS)

    def lrelu(z):
        return jnp.where(z >= 0, z, NEG_SLOPE * z)

    y = lrelu(inorm(conv(x, w1)))
    y = lrelu(inorm(conv(y, w2)))
    return jnp.transpose(y, (0, 3, 1, 2))


if __name__ == "__main__":
    key = jax.random.PRNGKey(0)
    kx, k1, k2 = jax.random.split(key, 3)

    x = jax.random.normal(kx, (N, CIN, H, W), dtype=jnp.float32)
    # Deterministic synthetic weights (kaiming-ish scale), layout (KH, KW, Cin, Cout).
    w1 = jax.random.normal(k1, (K, K, CIN, COUT), dtype=jnp.float32) * (1.0 / np.sqrt(K * K * CIN))
    w2 = jax.random.normal(k2, (K, K, COUT, COUT), dtype=jnp.float32) * (1.0 / np.sqrt(K * K * COUT))

    out = unet_basic_block(x, w1, w2)
    out = jax.block_until_ready(out)

    ref = jax.block_until_ready(_ref_forward(x, w1, w2))
    assert out.shape == (N, COUT, H, W)
    # Tolerance loosened vs the all-f32 version: MXU operands are explicitly bf16
    # (f32 accumulation); the f32 reference differs by O(1e-2) after two norm layers.
    np.testing.assert_allclose(np.asarray(out), np.asarray(ref), atol=3e-2, rtol=3e-2)

    print("KERNEL_OK")
</pallas_src>

<mosaic_0001>
module attributes {stable_mosaic.version = 11 : i64} {
  func.func @unet_block_kernel(%arg0: i32, %arg1: memref<1x8x256xf32, #tpu.memory_space<vmem>>, %arg2: memref<2x8x72xbf16, #tpu.memory_space<vmem>>, %arg3: memref<72x256xf32, #tpu.memory_space<vmem>>, %arg4: memref<1x8x256xf32, #tpu.memory_space<vmem>>) attributes {dimension_semantics = [#tpu.dimension_semantics<parallel>], iteration_bounds = array<i64: 2>, scalar_prefetch = 0 : i64, scratch_operands = 0 : i64, tpu.core_type = #tpu.core_type<tc>, window_params = [{transform_indices = @transform_0, window_bounds = array<i64: 1, 8, 256>}, {pipeline_mode = #tpu.pipeline_mode<synchronous>, transform_indices = @transform_1, window_bounds = array<i64: 2, 8, 72>}, {pipeline_mode = #tpu.pipeline_mode<synchronous>, transform_indices = @transform_2, window_bounds = array<i64: 72, 256>}, {transform_indices = @transform_3, window_bounds = array<i64: 1, 8, 256>}]} {
    %c0 = arith.constant 0 : index
    %c0_0 = arith.constant 0 : index
    %0 = vector.load %arg3[%c0, %c0_0] : memref<72x256xf32, #tpu.memory_space<vmem>>, vector<72x256xf32>
    %c0_1 = arith.constant 0 : index
    %c0_2 = arith.constant 0 : index
    %c0_3 = arith.constant 0 : index
    %1 = vector.load %arg1[%c0_1, %c0_2, %c0_3] : memref<1x8x256xf32, #tpu.memory_space<vmem>>, vector<1x8x256xf32>
    %2 = vector.shape_cast %1 : vector<1x8x256xf32> to vector<8x256xf32>
    %c0_4 = arith.constant 0 : index
    %c0_5 = arith.constant 0 : index
    %c0_6 = arith.constant 0 : index
    %3 = vector.load %arg2[%c0_4, %c0_5, %c0_6] : memref<2x8x72xbf16, #tpu.memory_space<vmem>>, vector<1x8x72xbf16>
    %4 = vector.shape_cast %3 : vector<1x8x72xbf16> to vector<8x72xbf16>
    %c17_i32 = arith.constant 17 : i32
    %5 = tpu.dynamic_rotate %2 by %c17_i32 dim 1 : vector<8x256xf32>, i32 -> vector<8x256xf32>
    %c16_i32 = arith.constant 16 : i32
    %6 = tpu.dynamic_rotate %2 by %c16_i32 dim 1 : vector<8x256xf32>, i32 -> vector<8x256xf32>
    %c15_i32 = arith.constant 15 : i32
    %7 = tpu.dynamic_rotate %2 by %c15_i32 dim 1 : vector<8x256xf32>, i32 -> vector<8x256xf32>
    %c1_i32 = arith.constant 1 : i32
    %8 = tpu.dynamic_rotate %2 by %c1_i32 dim 1 : vector<8x256xf32>, i32 -> vector<8x256xf32>
    %c255_i32 = arith.constant 255 : i32
    %9 = tpu.dynamic_rotate %2 by %c255_i32 dim 1 : vector<8x256xf32>, i32 -> vector<8x256xf32>
    %c241_i32 = arith.constant 241 : i32
    %10 = tpu.dynamic_rotate %2 by %c241_i32 dim 1 : vector<8x256xf32>, i32 -> vector<8x256xf32>
    %c240_i32 = arith.constant 240 : i32
    %11 = tpu.dynamic_rotate %2 by %c240_i32 dim 1 : vector<8x256xf32>, i32 -> vector<8x256xf32>
    %c239_i32 = arith.constant 239 : i32
    %12 = tpu.dynamic_rotate %2 by %c239_i32 dim 1 : vector<8x256xf32>, i32 -> vector<8x256xf32>
    %13 = tpu.concatenate %5, %6, %7, %8, %2, %9, %10, %11, %12 in 0 : vector<8x256xf32>, vector<8x256xf32>, vector<8x256xf32>, vector<8x256xf32>, vector<8x256xf32>, vector<8x256xf32>, vector<8x256xf32>, vector<8x256xf32>, vector<8x256xf32> -> vector<72x256xf32>
    %14 = arith.mulf %13, %0 : vector<72x256xf32>
    %15 = arith.truncf %14 : vector<72x256xf32> to vector<72x256xbf16>
    %cst = arith.constant dense<0.000000e+00> : vector<8x256xf32>
    %16 = tpu.matmul %4, %15, %cst {dimension_numbers = #tpu.dot_dimension_numbers<[1], [0], [0], [1], [0, 0, 1, 1], [], []>} : vector<8x72xbf16>, vector<72x256xbf16>, vector<8x256xf32> -> vector<8x256xf32>
    %17 = arith.mulf %16, %16 : vector<8x256xf32>
    %18 = tpu.concatenate %16, %17 in 0 : vector<8x256xf32>, vector<8x256xf32> -> vector<16x256xf32>
    %cst_7 = arith.constant dense<0.000000e+00> : vector<16xf32>
    %19 = vector.multi_reduction <add>, %18, %cst_7 [1] : vector<16x256xf32> to vector<16xf32>
    %20 = vector.shape_cast %19 : vector<16xf32> to vector<16x1xf32>
    %21 = vector.extract_strided_slice %20 {offsets = [0, 0], sizes = [8, 1], strides = [1, 1]} : vector<16x1xf32> to vector<8x1xf32>
    %cst_8 = arith.constant 3.906250e-03 : f32
    %22 = vector.broadcast %cst_8 : f32 to vector<8x1xf32>
    %23 = arith.mulf %21, %22 : vector<8x1xf32>
    %24 = vector.extract_strided_slice %20 {offsets = [8, 0], sizes = [8, 1], strides = [1, 1]} : vector<16x1xf32> to vector<8x1xf32>
    %cst_9 = arith.constant 3.906250e-03 : f32
    %25 = vector.broadcast %cst_9 : f32 to vector<8x1xf32>
    %26 = arith.mulf %24, %25 : vector<8x1xf32>
    %27 = arith.mulf %23, %23 : vector<8x1xf32>
    %28 = arith.subf %26, %27 : vector<8x1xf32>
    %29 = vector.broadcast %23 : vector<8x1xf32> to vector<8x256xf32>
    %30 = arith.subf %16, %29 : vector<8x256xf32>
    %cst_10 = arith.constant 9.99999974E-6 : f32
    %31 = vector.broadcast %cst_10 : f32 to vector<8x1xf32>
    %32 = arith.addf %28, %31 : vector<8x1xf32>
    %33 = math.rsqrt %32 : vector<8x1xf32>
    %34 = vector.broadcast %33 : vector<8x1xf32> to vector<8x256xf32>
    %35 = arith.mulf %30, %34 : vector<8x256xf32>
    %cst_11 = arith.constant 0.000000e+00 : f32
    %36 = vector.broadcast %cst_11 : f32 to vector<8x256xf32>
    %37 = arith.cmpf oge, %35, %36 : vector<8x256xf32>
    %cst_12 = arith.constant 0.00999999977 : f32
    %38 = vector.broadcast %cst_12 : f32 to vector<8x256xf32>
    %39 = arith.mulf %38, %35 : vector<8x256xf32>
    %40 = arith.select %37, %35, %39 : vector<8x256xi1>, vector<8x256xf32>
    %c1 = arith.constant 1 : index
    %c0_13 = arith.constant 0 : index
    %c0_14 = arith.constant 0 : index
    %41 = vector.load %arg2[%c1, %c0_13, %c0_14] : memref<2x8x72xbf16, #tpu.memory_space<vmem>>, vector<1x8x72xbf16>
    %42 = vector.shape_cast %41 : vector<1x8x72xbf16> to vector<8x72xbf16>
    %c17_i32_15 = arith.constant 17 : i32
    %43 = tpu.dynamic_rotate %40 by %c17_i32_15 dim 1 : vector<8x256xf32>, i32 -> vector<8x256xf32>
    %c16_i32_16 = arith.constant 16 : i32
    %44 = tpu.dynamic_rotate %40 by %c16_i32_16 dim 1 : vector<8x256xf32>, i32 -> vector<8x256xf32>
    %c15_i32_17 = arith.constant 15 : i32
    %45 = tpu.dynamic_rotate %40 by %c15_i32_17 dim 1 : vector<8x256xf32>, i32 -> vector<8x256xf32>
    %c1_i32_18 = arith.constant 1 : i32
    %46 = tpu.dynamic_rotate %40 by %c1_i32_18 dim 1 : vector<8x256xf32>, i32 -> vector<8x256xf32>
    %c255_i32_19 = arith.constant 255 : i32
    %47 = tpu.dynamic_rotate %40 by %c255_i32_19 dim 1 : vector<8x256xf32>, i32 -> vector<8x256xf32>
    %c241_i32_20 = arith.constant 241 : i32
    %48 = tpu.dynamic_rotate %40 by %c241_i32_20 dim 1 : vector<8x256xf32>, i32 -> vector<8x256xf32>
    %c240_i32_21 = arith.constant 240 : i32
    %49 = tpu.dynamic_rotate %40 by %c240_i32_21 dim 1 : vector<8x256xf32>, i32 -> vector<8x256xf32>
    %c239_i32_22 = arith.constant 239 : i32
    %50 = tpu.dynamic_rotate %40 by %c239_i32_22 dim 1 : vector<8x256xf32>, i32 -> vector<8x256xf32>
    %51 = tpu.concatenate %43, %44, %45, %46, %40, %47, %48, %49, %50 in 0 : vector<8x256xf32>, vector<8x256xf32>, vector<8x256xf32>, vector<8x256xf32>, vector<8x256xf32>, vector<8x256xf32>, vector<8x256xf32>, vector<8x256xf32>, vector<8x256xf32> -> vector<72x256xf32>
    %52 = arith.mulf %51, %0 : vector<72x256xf32>
    %53 = arith.truncf %52 : vector<72x256xf32> to vector<72x256xbf16>
    %cst_23 = arith.constant dense<0.000000e+00> : vector<8x256xf32>
    %54 = tpu.matmul %42, %53, %cst_23 {dimension_numbers = #tpu.dot_dimension_numbers<[1], [0], [0], [1], [0, 0, 1, 1], [], []>} : vector<8x72xbf16>, vector<72x256xbf16>, vector<8x256xf32> -> vector<8x256xf32>
    %55 = arith.mulf %54, %54 : vector<8x256xf32>
    %56 = tpu.concatenate %54, %55 in 0 : vector<8x256xf32>, vector<8x256xf32> -> vector<16x256xf32>
    %cst_24 = arith.constant dense<0.000000e+00> : vector<16xf32>
    %57 = vector.multi_reduction <add>, %56, %cst_24 [1] : vector<16x256xf32> to vector<16xf32>
    %58 = vector.shape_cast %57 : vector<16xf32> to vector<16x1xf32>
    %59 = vector.extract_strided_slice %58 {offsets = [0, 0], sizes = [8, 1], strides = [1, 1]} : vector<16x1xf32> to vector<8x1xf32>
    %cst_25 = arith.constant 3.906250e-03 : f32
    %60 = vector.broadcast %cst_25 : f32 to vector<8x1xf32>
    %61 = arith.mulf %59, %60 : vector<8x1xf32>
    %62 = vector.extract_strided_slice %58 {offsets = [8, 0], sizes = [8, 1], strides = [1, 1]} : vector<16x1xf32> to vector<8x1xf32>
    %cst_26 = arith.constant 3.906250e-03 : f32
    %63 = vector.broadcast %cst_26 : f32 to vector<8x1xf32>
    %64 = arith.mulf %62, %63 : vector<8x1xf32>
    %65 = arith.mulf %61, %61 : vector<8x1xf32>
    %66 = arith.subf %64, %65 : vector<8x1xf32>
    %67 = vector.broadcast %61 : vector<8x1xf32> to vector<8x256xf32>
    %68 = arith.subf %54, %67 : vector<8x256xf32>
    %cst_27 = arith.constant 9.99999974E-6 : f32
    %69 = vector.broadcast %cst_27 : f32 to vector<8x1xf32>
    %70 = arith.addf %66, %69 : vector<8x1xf32>
    %71 = math.rsqrt %70 : vector<8x1xf32>
    %72 = vector.broadcast %71 : vector<8x1xf32> to vector<8x256xf32>
    %73 = arith.mulf %68, %72 : vector<8x256xf32>
    %cst_28 = arith.constant 0.000000e+00 : f32
    %74 = vector.broadcast %cst_28 : f32 to vector<8x256xf32>
    %75 = arith.cmpf oge, %73, %74 : vector<8x256xf32>
    %cst_29 = arith.constant 0.00999999977 : f32
    %76 = vector.broadcast %cst_29 : f32 to vector<8x256xf32>
    %77 = arith.mulf %76, %73 : vector<8x256xf32>
    %78 = arith.select %75, %73, %77 : vector<8x256xi1>, vector<8x256xf32>
    %c0_30 = arith.constant 0 : index
    %c0_31 = arith.constant 0 : index
    %c0_32 = arith.constant 0 : index
    %79 = vector.load %arg4[%c0_30, %c0_31, %c0_32] : memref<1x8x256xf32, #tpu.memory_space<vmem>>, vector<1x8x256xf32>
    %80 = vector.shape_cast %79 : vector<1x8x256xf32> to vector<8x256xf32>
    %81 = vector.shape_cast %78 : vector<8x256xf32> to vector<1x8x256xf32>
    tpu.vector_store %arg4[%c0_30, %c0_31, %c0_32], %81 {strides = array<i32>} : memref<1x8x256xf32, #tpu.memory_space<vmem>>, vector<1x8x256xf32>,
    return
  }
  func.func @transform_0(%arg0: i32) -> (i32, i32, i32) {
    %c0_i32 = arith.constant 0 : i32
    %c0_i32_0 = arith.constant 0 : i32
    %c0_i32_1 = arith.constant 0 : i32
    return %arg0, %c0_i32, %c0_i32_0 : i32, i32, i32
  }
  func.func @transform_1(%arg0: i32) -> (i32, i32, i32) {
    %c0_i32 = arith.constant 0 : i32
    %c0_i32_0 = arith.constant 0 : i32
    %c0_i32_1 = arith.constant 0 : i32
    %c0_i32_2 = arith.constant 0 : i32
    return %c0_i32, %c0_i32_0, %c0_i32_1 : i32, i32, i32
  }
  func.func @transform_2(%arg0: i32) -> (i32, i32) {
    %c0_i32 = arith.constant 0 : i32
    %c0_i32_0 = arith.constant 0 : i32
    %c0_i32_1 = arith.constant 0 : i32
    return %c0_i32, %c0_i32_0 : i32, i32
  }
  func.func @transform_3(%arg0: i32) -> (i32, i32, i32) {
    %c0_i32 = arith.constant 0 : i32
    %c0_i32_0 = arith.constant 0 : i32
    %c0_i32_1 = arith.constant 0 : i32
    return %arg0, %c0_i32, %c0_i32_0 : i32, i32, i32
  }
}

</mosaic_0001>

<bundles_post_ra>
// kernel: tpu_custom_call.1
= control target key start
LH: loop header
LB: loop body
LE: loop exit
PB: predicated region body
PF: predicated region fallthrough
CT: control target
= control target key end

     0   :  { %8 = vsyncpa [#allocation3], 0  ;;  %s1400_s0 = inlined_call_operand.hbm [shape: f32[2,8,256], index: 0, kind: input, shape index: {}]   ;;  %s1401_s1 = inlined_call_operand.hbm [shape: bf16[2,8,72], index: 1, kind: input, shape index: {}]   ;;  %s1402_s2 = inlined_call_operand.hbm [shape: f32[72,256], index: 2, kind: input, shape index: {}]   ;;  %s1403_s3 = inlined_call_operand.hbm [shape: f32[2,8,256], index: 3, kind: output, shape index: {}]  }
   0x1   :  { %10 = vsyncpa [#allocation3 + $0x1], 0 }
   0x2   :  { %11 = vsyncpa [#allocation6], 0 }
   0x3   :  { %12 = vsyncpa [#allocation4], 0 }
   0x4   :  { %14 = vsyncpa [#allocation4 + $0x1], 0  ;;  %s961_s12 = smov 0   ;;  %s963_s13 = smov 0  }
   0x5   :  { %s965_s14 = smov 0   ;;  %s967_s15 = smov 0  }
   0x6 LB: > { %s982_s16 = sadd.s32 4294967295, %s922_s15   ;;  %s658_s17 = sadd.s32 4294967294, %s922_s15   ;;  %s922_s15 = sphi %s967_s15, %s1423_s15   ;;  %s918_s14 = sphi %s965_s14, %s1422_s14   ;;  %s914_s13 = sphi %s963_s13, %s1421_s13   ;;  %s910_s12 = sphi %s961_s12, %s1420_s12  }
   0x7   : > { %p40_p0 = scmp.ne.s32.totalorder %s914_s13, %s910_s12  ;;  %p1404_p1 = scmp.eq.s32.totalorder %s982_s16, 0 }
   0x8   : > { %p112_p3 = scmp.eq.s32.totalorder %s658_s17, 1  ;;  %p659_p5 = scmp.ge.s32.totalorder %s922_s15, 1 }
   0x9   : > { %p991_p4 = por %p1404_p1, %p40_p0  ;;  %p119_p7 = scmp.lt.s32.totalorder %s922_s15, 3 }
   0xa   : > { %p996_p6 = por %p112_p3, %p40_p0  ;;  %s924_s21 = smov [#allocation5]  }
   0xb   : > { %s1407_s18 = scalar_select %p991_p4, 1, 0 }
   0xc   : > { %s1408_s19 = scalar_select %p996_p6, 1, 0 }
   0xd   : > { %p1001_p8 = pnand %p659_p5, %p119_p7  ;;  %s131_s22 = sshll.u32 %s924_s21, 4  ;;  %s1005_s22 = int_to_ptr.vmem [resolvable:$true] %s131_s22 }
   0xe   : > { %s925_s24 = smov [#allocation7]   ;;  %s766_s28 = scalar_lea.hbm %s1401_s1, 128 }
   0xf   : > { %p694_p9 = pneg %p1001_p8  ;;  %s144_s25 = sshll.u32 %s925_s24, 4  ;;  %s1016_s25 = int_to_ptr.vmem [resolvable:$true] %s144_s25 }
  0x10   : > { %p767_p12 = scmp.ne.s32.totalorder %s1401_s1, %s766_s28  ;;  %p773_p5 = scmp.lt.u32.totalorder %s766_s28, %s1401_s1 }
  0x11   : > { %p1012_p11 = pnand %p694_p9, %p1404_p1 }
  0x13   : > { %p768_p13 = pneg %p1012_p11 }
  0x15   : > { %p769_p0 = pnand %p768_p13, %p767_p12 }
  0x17   : > { %p770_p3 = pneg %p769_p0 }
  0x19   : > { %p775_p7 = pnand %p773_p5, %p770_p3 }
  0x1b   : > { %778 = shalt.err (!%p775_p7)
}
  0x1c   : > { %s779_s6 = scalar_lea.vmem %s1005_s22, 128  ;;  %p787_p2 = scmp.lt.s32.totalorder %s1005_s22, %s1005_s22 }
  0x1d   : > { %p780_p9 = scmp.ne.s32.totalorder %s1005_s22, %s779_s6  ;;  %p788_p12 = scmp.lt.s32.totalorder %s779_s6, %s779_s6 }
  0x1f   : > { %p782_p10 = pnand %p780_p9, %p768_p13  ;;  %p789_p0 = por %p788_p12, %p787_p2 }
  0x21   : > { %p783_p1 = pneg %p782_p10 }
  0x23   : > { %p790_p6 = pnand %p789_p0, %p783_p1 }
  0x25   : > { %793 = shalt.err (!%p790_p6)
}
  0x26   : > { %s926_s7 = smov 64   ;;  %s927_s8 = smov 4  }
  0x27   : > { %697 = dma.hbm_to_vmem [thread:$0]  (!%p1012_p11), %s1401_s1, 128, %s1005_s22, [#allocation6], %s926_s7, %s926_s7, %s927_s8  }
  0x28   : > { %s794_s21 = scalar_lea.hbm %s1402_s2, 2304 }
  0x29   : > { %p795_p2 = scmp.ne.s32.totalorder %s1402_s2, %s794_s21  ;;  %p801_p10 = scmp.lt.u32.totalorder %s794_s21, %s1402_s2 }
  0x2b   : > { %p797_p1 = pnand %p795_p2, %p768_p13 }
  0x2d   : > { %p798_p6 = pneg %p797_p1 }
  0x2f   : > { %p803_p3 = pnand %p801_p10, %p798_p6 }
  0x31   : > { %806 = shalt.err (!%p803_p3)
}
  0x32   : > { %s807_s22 = scalar_lea.vmem %s1016_s25, 2304  ;;  %p815_p12 = scmp.lt.s32.totalorder %s1016_s25, %s1016_s25 }
  0x33   : > { %p808_p5 = scmp.ne.s32.totalorder %s1016_s25, %s807_s22  ;;  %p816_p0 = scmp.lt.s32.totalorder %s807_s22, %s807_s22 }
  0x35   : > { %p810_p7 = pnand %p808_p5, %p768_p13  ;;  %p817_p2 = por %p816_p0, %p815_p12 }
  0x37   : > { %p811_p9 = pneg %p810_p7 }
  0x39   : > { %p818_p1 = pnand %p817_p2, %p811_p9 }
  0x3b   : > { %821 = shalt.err (!%p818_p1)
}
  0x3c   : > { %s928_s29 = smov 256   ;;  %s929_s30 = smov 16  }
  0x3d   : > { %700 = dma.hbm_to_vmem [thread:$0]  (!%p1012_p11), %s1402_s2, 2304, %s1016_s25, [#allocation6], %s928_s29, %s928_s29, %s929_s30  }
  0x3e   : > { %s1071_s6 = sadd.s32 1, %s922_s15   ;;  %s27_s8 = sadd.s32 1, %s918_s14 }
  0x3f   : > { %s24_s7 = ssub.s32 %s922_s15, %s1071_s6  ;;  %p34_p6 = scmp.ne.s32.totalorder %s918_s14, %s914_s13 }
  0x40   : > { %p25_p13 = scmp.eq.s32.totalorder %s24_s7, 0  ;;  %p35_p10 = scmp.eq.s32.totalorder %s922_s15, 0 }
  0x41   : > { %p1411_p5 = scmp.eq.s32.totalorder %s982_s16, 1  ;;  %p711_p9 = scmp.lt.s32.totalorder %s922_s15, 2 }
  0x42   : > { %s1080_s9 = scalar_select %p25_p13, %s918_s14, %s27_s8  }
  0x43   : > { %p36_p3 = por %p35_p10, %p34_p6  ;;  %p1084_p7 = por %p1411_p5, %p34_p6 }
  0x44   : > { %s158_s23 = sand.u32 1, %s918_s14   ;;  %s680_s25 = sshll.u32 %s922_s15, 8 }
  0x45   : > { %s1412_s10 = scalar_select %p1084_p7, 1, 0 }
  0x46   : > { %s663_s11 = sshll.u32 %s158_s23, 4  ;;  %s1094_s24 = scalar_lea.hbm %s1400_s0, %s680_s25 }
  0x47   : > { %s162_s26 = scalar_lea.vmem [#allocation2], %s663_s11  ;;  %p1098_p11 = pnand %p711_p9, %p36_p3 }
  0x48   : > { %s170_s27 = sshll.u32 %s162_s26, 4  ;;  %s159_s22 = scalar_lea.sflag [#allocation3], %s158_s23  ;;  %s1096_s27 = int_to_ptr.vmem [resolvable:$true] %s170_s27 }
  0x49   : > { %s822_s29 = scalar_lea.hbm %s1094_s24, 256  ;;  %p824_p0 = pneg %p1098_p11 }
  0x4a   : > { %p823_p12 = scmp.ne.s32.totalorder %s1094_s24, %s822_s29  ;;  %s827_s5 = scalar_lea.hbm %s1400_s0, 512 }
  0x4b   : > { %p828_p13 = scmp.lt.u32.totalorder %s1094_s24, %s1400_s0  ;;  %p829_p6 = scmp.lt.u32.totalorder %s827_s5, %s822_s29 }
  0x4c   : > { %p825_p2 = pnand %p824_p0, %p823_p12  ;;  %p831_p3 = scmp.lt.u32.totalorder %s822_s29, %s1094_s24 }
  0x4d   : > { %p830_p10 = por %p829_p6, %p828_p13 }
  0x4e   : > { %p826_p1 = pneg %p825_p2 }
  0x4f   : > { %p832_p5 = por %p831_p3, %p830_p10 }
  0x51   : > { %p833_p9 = pnand %p832_p5, %p826_p1 }
  0x53   : > { %836 = shalt.err (!%p833_p9)
}
  0x54   : > { %s837_s23 = scalar_lea.vmem %s1096_s27, 256  ;;  %s930_s11 = smov [#allocation2]  }
  0x55   : > { %p838_p12 = scmp.ne.s32.totalorder %s1096_s27, %s837_s23  ;;  %s842_s25 = sshll.u32 %s930_s11, 4  ;;  %s843_s25 = int_to_ptr.vmem [resolvable:$false] %s842_s25 }
  0x56   : > { %s844_s17 = scalar_lea.vmem %s843_s25, 512  ;;  %p845_p4 = scmp.lt.s32.totalorder %s1096_s27, %s843_s25 }
  0x57   : > { %p840_p2 = pnand %p838_p12, %p824_p0  ;;  %p846_p13 = scmp.lt.s32.totalorder %s844_s17, %s837_s23 }
  0x59   : > { %p841_p7 = pneg %p840_p2  ;;  %p847_p6 = por %p846_p13, %p845_p4 }
  0x5b   : > { %p848_p10 = pnand %p847_p6, %p841_p7 }
  0x5d   : > { %851 = shalt.err (!%p848_p10)
}
  0x5e   : > { %704 = dma.hbm_to_vmem [thread:$0]  (!%p1098_p11), %s1094_s24, 256, %s1096_s27, %s159_s22  }
  0x5f   : > { %179 = sbr.rel (%p1001_p8) target bundleno = 1187 (0x4a3), region = 32  ;;  %s1130_s21 = sand.u32 (!%p1001_p8), 1, %s914_s13  }
  0x60   : > { %s667_s26 = sshll.u32 (!%p1001_p8), %s1130_s21, 4  ;;  %s182_s29 = scalar_lea.sflag (!%p1001_p8), [#allocation3], %s1130_s21 }
  0x61   : > { %s185_s30 = scalar_lea.vmem (!%p1001_p8), [#allocation2], %s667_s26  ;;  %p1414_p4 = scmp.ne.s32.totalorder (!%p1001_p8), %s1407_s18, 0 }
  0x66   : > { %897 = dma.done.wait (%p1414_p4), %s182_s29, 256  }
  0x67   : > { %899 = vsyncadd (%p1414_p4), %s182_s29, 4294967040  ;;  %p1415_p7 = scmp.eq.s32.totalorder %s982_s16, 0 }
  0x69   : > { %901 = dma.done.wait (%p1415_p7), [#allocation6], 2432   ;;  %p1416_p8 = pmov %p1415_p7 }
  0x6a   : > { %v1144_v0 = vld [vmem:[%s185_s30] sm:$0xff]  ;;  %s931_s20 = smov 16   ;;  %s932_s24 = smov 17   ;;  %v1150_v1 = vld [vmem:[%s185_s30 + $0x8] sm:$0xff]  ;;  %v937_v2 = vmov 0   ;;  %v242_v3 = vlaneseq  ;;  %vm328_vm8 = vcmask 1043456  }
  0x6b   : > { %903 = vsyncadd (%p1416_p8), [#allocation6], 4294964864  ;;  %247 = vrot.lane.b32.xlu1 %v1144_v0, %s931_s20  ;;  %238 = vrot.lane.b32.xlu0 %v1144_v0, %s932_s24  ;;  %s933_s18 = smov 15   ;;  %s934_s27 = smov 1   ;;  %v1183_v7 = vld [vmem:[#allocation7 + $0x10] sm:$0xff]  ;;  %v1186_v8 = vld [vmem:[#allocation7] sm:$0xff] }
  0x6c   : > { %s935_s28 = smov 127   ;;  %s936_s22 = smov 113   ;;  %367 = vmatprep.mubr.bf16.mxu0 %v937_v2  ;;  %519 = vmatprep.mubr.bf16.mxu1 %v937_v2  ;;  %v1180_v4 = vand.u32 127, %v242_v3  ;;  %v1188_v9 = vld [vmem:[#allocation7 + $0x8] sm:$0xff]  ;;  %v1190_v10 = vld [vmem:[#allocation7 + $0x18] sm:$0xff]  ;;  %v1205_v25 = vld [vmem:[#allocation7 + $0x20] sm:$0xff] }
  0x6d   : > { %s938_s4 = smov 112   ;;  %s939_s5 = smov 111   ;;  %v1208_v26 = vld [vmem:[#allocation7 + $0x28] sm:$0xff]  ;;  %v1214_v29 = vld [vmem:[#allocation7 + $0x30] sm:$0xff]  ;;  %v1216_v30 = vld [vmem:[#allocation7 + $0x38] sm:$0xff]  ;;  %vm324_vm9 = vcmask 588800  }
  0x6e   : > { %vm251_vm0 = vcmp.lt.s32.totalorder %v1180_v4, 16  ;;  %vm244_vm1 = vcmp.lt.s32.totalorder %v1180_v4, 17  ;;  %vm258_vm2 = vcmp.lt.s32.totalorder %v1180_v4, 15  ;;  %vm265_vm3 = vcmp.lt.s32.totalorder %v1180_v4, 1  ;;  %v1223_v35 = vld [vmem:[#allocation7 + $0x48] sm:$0xff]  ;;  %v1225_v36 = vld [vmem:[#allocation7 + $0x40] sm:$0xff] }
  0x6f   : > { %249 = vrot.lane.b32.xlu1 %v1150_v1, %s931_s20  ;;  %240 = vrot.lane.b32.xlu0 %v1150_v1, %s932_s24  ;;  %vm272_vm4 = vcmp.lt.s32.totalorder %v1180_v4, 127  ;;  %v1231_v41 = vld [vmem:[#allocation7 + $0x50] sm:$0xff]  ;;  %v1233_v42 = vld [vmem:[#allocation7 + $0x58] sm:$0xff]  ;;  %v305_v47 = vmul.f32 %v1150_v1, %v1223_v35  ;;  %v304_v48 = vmul.f32 %v1144_v0, %v1225_v36  ;;  %vm279_vm5 = vcmp.lt.s32.totalorder %v1180_v4, 113  ;;  %v1246_v57 = vld [vmem:[#allocation7 + $0x60] sm:$0xff]  ;;  %s681_s7 = sshll.u32 %s982_s16, 8 }
  0x70   : > { %vm286_vm6 = vcmp.lt.s32.totalorder %v1180_v4, 112  ;;  %v1249_v58 = vld [vmem:[#allocation7 + $0x68] sm:$0xff]  ;;  %v1255_v61 = vld [vmem:[#allocation7 + $0x70] sm:$0xff]  ;;  %v1257_v62 = vld [vmem:[#allocation7 + $0x78] sm:$0xff]  ;;  %vm293_vm7 = vcmp.lt.s32.totalorder %v1180_v4, 111  ;;  %s215_s8 = scalar_lea.vmem [#allocation8], %s667_s26  ;;  %s1356_s17 = scalar_lea.hbm %s1403_s3, %s681_s7 }
  0x71   : > { %s569_s23 = sshll.u32 %s215_s8, 4  ;;  %s555_s16 = scalar_lea.sflag [#allocation4], %s1130_s21  ;;  %s1358_s23 = int_to_ptr.vmem [resolvable:$true] %s569_s23 }
  0x72   : > { %s852_s26 = scalar_lea.vmem %s1358_s23, 256  ;;  %p1417_p0 = scmp.ne.s32.totalorder %s1412_s10, 0 }
  0x73   : > { %256 = vrot.lane.b32.xlu1 %v1150_v1, %s933_s18  ;;  %254 = vrot.lane.b32.xlu0 %v1144_v0, %s933_s18  ;;  %p853_p11 = scmp.ne.s32.totalorder %s1358_s23, %s852_s26  ;;  %s940_s29 = smov [#allocation8]  }
  0x74   : > { %s856_s30 = sshll.u32 %s940_s29, 4  ;;  %s857_s30 = int_to_ptr.vmem [resolvable:$false] %s856_s30 }
  0x75   : > { %p854_p1 = pnand %p853_p11, %p1417_p0  ;;  %p859_p5 = scmp.lt.s32.totalorder %s1358_s23, %s857_s30 }
  0x77   : > { %263 = vrot.lane.b32.xlu1 %v1150_v1, %s934_s27  ;;  %261 = vrot.lane.b32.xlu0 %v1144_v0, %s934_s27  ;;  %p855_p3 = pneg %p854_p1 }
  0x7b   : > { %270 = vrot.lane.b32.xlu1 %v1150_v1, %s935_s28  ;;  %268 = vrot.lane.b32.xlu0 %v1144_v0, %s935_s28 }
  0x7f   : > { %277 = vrot.lane.b32.xlu1 %v1150_v1, %s936_s22  ;;  %275 = vrot.lane.b32.xlu0 %v1144_v0, %s936_s22 }
  0x83   : > { %284 = vrot.lane.b32.xlu1 %v1150_v1, %s938_s4  ;;  %282 = vrot.lane.b32.xlu0 %v1144_v0, %s938_s4 }
  0x87   : > { %291 = vrot.lane.b32.xlu1 %v1150_v1, %s939_s5  ;;  %289 = vrot.lane.b32.xlu0 %v1144_v0, %s939_s5 }
  0xdd   : > { %v248_v5 = vpop.permute.xlu1 %247  ;;  %v239_v6 = vpop.permute.xlu0 %238 }
  0xe1   : > { %v250_v11 = vpop.permute.xlu1 %249  ;;  %v241_v12 = vpop.permute.xlu0 %240 }
  0xe2   : > { %v252_v13 = vsel %vm251_vm0, %v248_v5, %v250_v11  ;;  %v253_v14 = vsel %vm251_vm0, %v250_v11, %v248_v5  ;;  %v245_v15 = vsel %vm244_vm1, %v239_v6, %v241_v12  ;;  %v246_v16 = vsel %vm244_vm1, %v241_v12, %v239_v6  ;;  %v1268_v12 = vld [vmem:[#allocation7 + $0x80] sm:$0xff] }
  0xe3   : > { %v298_v17 = vmul.f32 %v253_v14, %v1183_v7  ;;  %v296_v18 = vmul.f32 %v246_v16, %v1186_v8  ;;  %v297_v19 = vmul.f32 %v245_v15, %v1188_v9  ;;  %v299_v20 = vmul.f32 %v252_v13, %v1190_v10  ;;  %v1270_v13 = vld [vmem:[#allocation7 + $0x88] sm:$0xff] }
  0xe5   : > { %v257_v21 = vpop.permute.xlu1 %256  ;;  %v255_v22 = vpop.permute.xlu0 %254  ;;  %v315_v23 = vpack.c.bf16 %v299_v20, %v297_v19  ;;  %v314_v24 = vpack.c.bf16 %v298_v17, %v296_v18 }
  0xe6   : > { %v259_v27 = vsel %vm258_vm2, %v255_v22, %v257_v21  ;;  %v260_v28 = vsel %vm258_vm2, %v257_v21, %v255_v22 }
  0xe7   : > { %335 = vmatprep.subr.bf16.mxu0 %v315_v23  ;;  %v300_v37 = vmul.f32 %v260_v28, %v1205_v25  ;;  %v301_v38 = vmul.f32 %v259_v27, %v1208_v26  ;;  %v237_v27 = vld [vmem:[#allocation5] sm:$0xf] }
  0xe8   : > { %336 = vmatpush1.bf16.msra.mxu0 %v314_v24 }
  0xe9   : > { %v264_v31 = vpop.permute.xlu1 %263  ;;  %v262_v32 = vpop.permute.xlu0 %261 }
  0xea   : > { %v266_v33 = vsel %vm265_vm3, %v262_v32, %v264_v31  ;;  %v267_v34 = vsel %vm265_vm3, %v264_v31, %v262_v32 }
  0xeb   : > { %v302_v39 = vmul.f32 %v267_v34, %v1214_v29  ;;  %v303_v40 = vmul.f32 %v266_v33, %v1216_v30 }
  0xed   : > { %v271_v43 = vpop.permute.xlu1 %270  ;;  %v269_v44 = vpop.permute.xlu0 %268  ;;  %v317_v45 = vpack.c.bf16 %v303_v40, %v301_v38  ;;  %v316_v46 = vpack.c.bf16 %v302_v39, %v300_v37 }
  0xee   : > { %v273_v49 = vsel %vm272_vm4, %v269_v44, %v271_v43  ;;  %v274_v50 = vsel %vm272_vm4, %v271_v43, %v269_v44 }
  0xef   : > { %v306_v51 = vmul.f32 %v273_v49, %v1231_v41  ;;  %v307_v52 = vmul.f32 %v274_v50, %v1233_v42  ;;  %337 = vmatprep.subr.bf16.mxu0 %v317_v45 }
  0xf0   : > { %338 = vmatpush1.bf16.msra.mxu0 %v316_v46 }
  0xf1   : > { %v278_v53 = vpop.permute.xlu1 %277  ;;  %v276_v54 = vpop.permute.xlu0 %275  ;;  %v319_v55 = vpack.c.bf16 %v307_v52, %v305_v47  ;;  %v318_v56 = vpack.c.bf16 %v306_v51, %v304_v48 }
  0xf2   : > { %v280_v59 = vsel %vm279_vm5, %v276_v54, %v278_v53  ;;  %v281_v60 = vsel %vm279_vm5, %v278_v53, %v276_v54 }
  0xf3   : > { %339 = vmatprep.subr.bf16.mxu0 %v319_v55  ;;  %v308_v3 = vmul.f32 %v280_v59, %v1246_v57  ;;  %v309_v5 = vmul.f32 %v281_v60, %v1249_v58 }
  0xf4   : > { %340 = vmatpush1.bf16.msra.mxu0 %v318_v56 }
  0xf5   : > { %v285_v63 = vpop.permute.xlu1 %284  ;;  %v283_v0 = vpop.permute.xlu0 %282 }
  0xf6   : > { %v287_v1 = vsel %vm286_vm6, %v283_v0, %v285_v63  ;;  %v288_v2 = vsel %vm286_vm6, %v285_v63, %v283_v0 }
  0xf7   : > { %v310_v6 = vmul.f32 %v287_v1, %v1255_v61  ;;  %v311_v11 = vmul.f32 %v288_v2, %v1257_v62 }
  0xf9   : > { %v292_v14 = vpop.permute.xlu1 %291  ;;  %v290_v15 = vpop.permute.xlu0 %289  ;;  %v321_v16 = vpack.c.bf16 %v311_v11, %v309_v5  ;;  %v320_v17 = vpack.c.bf16 %v310_v6, %v308_v3 }
  0xfa   : > { %v294_v18 = vsel %vm293_vm7, %v290_v15, %v292_v14  ;;  %v295_v19 = vsel %vm293_vm7, %v292_v14, %v290_v15 }
  0xfb   : > { %v312_v20 = vmul.f32 %v294_v18, %v1268_v12  ;;  %v313_v21 = vmul.f32 %v295_v19, %v1270_v13  ;;  %341 = vmatprep.subr.bf16.mxu0 %v321_v16 }
  0xfc   : > { %342 = vmatpush1.bf16.msra.mxu0 %v320_v17 }
  0xfd   : > { %v322_v22 = vpack.c.bf16 %v312_v20, %v312_v20  ;;  %v323_v23 = vpack.c.bf16 %v313_v21, %v313_v21 }
  0xff   : > { %671 = vmatprep.subr.msk.bf16.mxu0 %vm328_vm8, %v323_v23  ;;  %v330_v24 = vsel %vm328_vm8, %v322_v22, 0 }
 0x100   : > { %344 = vmatpush1.bf16.msra.mxu0 %v330_v24 }
 0x103   : > { %672 = vmatmul.mubr.msk.bf16.vlgmr.msra.gmra.mrb[0].mxu0 %vm324_vm9, %v237_v27 }
 0x1d6   : > { %v369_v28 = vpop.f32.mrb[0].mxu0 }
 0x1d7   : > { %v371_v31 = vpop.f32.mrb[1].mxu0  ;;  %v376_v32 = vmul.f32 %v369_v28, %v369_v28 }
 0x1d8   : > { %v373_v33 = vpop.f32.mrb[2].mxu0  ;;  %v378_v34 = vadd.f32 %v371_v31, %v369_v28  ;;  %v377_v37 = vmul.f32 %v371_v31, %v371_v31 }
 0x1d9   : > { %v374_v38 = vpop.f32.mrb[3].mxu0 }
 0x1da   : > { %379 = vadd.xlane.f32.xlu0 %v378_v34  ;;  %v381_v39 = vadd.f32 %v377_v37, %v376_v32 }
 0x1dc   : > { %382 = vadd.xlane.f32.xlu1 %v381_v39 }
 0x267   : > { %v380_v40 = vpop.xlane.xlu0 %379 }
 0x268   : > { %v384_v43 = vmul.f32 0.00390625, %v380_v40 }
 0x269   : > { %v383_v44 = vpop.xlane.xlu1 %382 }
 0x26a   : > { %v386_v45 = vmul.f32 %v384_v43, %v384_v43  ;;  %v385_v46 = vmul.f32 0.00390625, %v383_v44  ;;  %v388_v49 = vsub.f32 %v369_v28, %v384_v43  ;;  %v389_v50 = vsub.f32 %v371_v31, %v384_v43 }
 0x26c   : > { %v387_v47 = vsub.f32 %v385_v46, %v386_v45 }
 0x26e   : > { %v390_v48 = vadd.f32 1e-05, %v387_v47 }
 0x270   : > { %762 = vrsqrt.f32 %v390_v48 }
 0x27a   : > { %v763_v51 = vpop.eup %762 }
 0x27b   : > { %v392_v52 = vmul.f32 %v763_v51, %v388_v49  ;;  %v393_v53 = vmul.f32 %v763_v51, %v389_v50 }
 0x27d   : > { %vm394_vm10 = vcmp.ge.f32.partialorder %v392_v52, 0.0  ;;  %vm395_vm11 = vcmp.ge.f32.partialorder %v393_v53, 0.0  ;;  %v396_v54 = vmul.f32 0.01, %v392_v52  ;;  %v397_v55 = vmul.f32 0.01, %v393_v53 }
 0x27f   : > { %v398_v56 = vsel %vm394_vm10, %v392_v52, %v396_v54  ;;  %v399_v59 = vsel %vm395_vm11, %v393_v53, %v397_v55 }
 0x280   : > { %404 = vrot.lane.b32.xlu1 %v399_v59, %s932_s24  ;;  %402 = vrot.lane.b32.xlu0 %v398_v56, %s932_s24 }
 0x284   : > { %410 = vrot.lane.b32.xlu1 %v399_v59, %s931_s20  ;;  %408 = vrot.lane.b32.xlu0 %v398_v56, %s931_s20  ;;  %s858_s20 = scalar_lea.vmem %s857_s30, 512 }
 0x285   : > { %p860_p9 = scmp.lt.s32.totalorder %s858_s20, %s852_s26 }
 0x287   : > { %p861_p12 = por %p860_p9, %p859_p5 }
 0x288   : > { %416 = vrot.lane.b32.xlu1 %v399_v59, %s933_s18  ;;  %414 = vrot.lane.b32.xlu0 %v398_v56, %s933_s18 }
 0x289   : > { %p862_p2 = pnand %p861_p12, %p855_p3 }
 0x28c   : > { %422 = vrot.lane.b32.xlu1 %v399_v59, %s934_s27  ;;  %420 = vrot.lane.b32.xlu0 %v398_v56, %s934_s27 }
 0x290   : > { %428 = vrot.lane.b32.xlu1 %v399_v59, %s935_s28  ;;  %426 = vrot.lane.b32.xlu0 %v398_v56, %s935_s28 }
 0x294   : > { %434 = vrot.lane.b32.xlu1 %v399_v59, %s936_s22  ;;  %432 = vrot.lane.b32.xlu0 %v398_v56, %s936_s22 }
 0x298   : > { %440 = vrot.lane.b32.xlu1 %v399_v59, %s938_s4  ;;  %438 = vrot.lane.b32.xlu0 %v398_v56, %s938_s4 }
 0x29c   : > { %446 = vrot.lane.b32.xlu1 %v399_v59, %s939_s5  ;;  %444 = vrot.lane.b32.xlu0 %v398_v56, %s939_s5 }
 0x2f2   : > { %v405_v60 = vpop.permute.xlu1 %404  ;;  %v403_v63 = vpop.permute.xlu0 %402 }
 0x2f3   : > { %v406_v0 = vsel %vm244_vm1, %v403_v63, %v405_v60  ;;  %v407_v1 = vsel %vm244_vm1, %v405_v60, %v403_v63  ;;  %v401_v60 = vld [vmem:[#allocation5 + $0x4] sm:$0xf] }
 0x2f4   : > { %v450_v11 = vmul.f32 %v407_v1, %v1186_v8  ;;  %v451_v15 = vmul.f32 %v406_v0, %v1188_v9 }
 0x2f6   : > { %v411_v2 = vpop.permute.xlu1 %410  ;;  %v409_v3 = vpop.permute.xlu0 %408 }
 0x2f7   : > { %v412_v5 = vsel %vm251_vm0, %v409_v3, %v411_v2  ;;  %v413_v6 = vsel %vm251_vm0, %v411_v2, %v409_v3 }
 0x2f8   : > { %v452_v14 = vmul.f32 %v413_v6, %v1183_v7  ;;  %v453_v16 = vmul.f32 %v412_v5, %v1190_v10 }
 0x2fa   : > { %v417_v17 = vpop.permute.xlu1 %416  ;;  %v415_v18 = vpop.permute.xlu0 %414  ;;  %v469_v19 = vpack.c.bf16 %v453_v16, %v451_v15  ;;  %v468_v20 = vpack.c.bf16 %v452_v14, %v450_v11 }
 0x2fb   : > { %v418_v21 = vsel %vm258_vm2, %v415_v18, %v417_v17  ;;  %v419_v22 = vsel %vm258_vm2, %v417_v17, %v415_v18 }
 0x2fc   : > { %487 = vmatprep.subr.bf16.mxu1 %v469_v19  ;;  %v454_v10 = vmul.f32 %v419_v22, %v1205_v25  ;;  %v455_v24 = vmul.f32 %v418_v21, %v1208_v26  ;;  %v459_v26 = vmul.f32 %v399_v59, %v1223_v35 }
 0x2fd   : > { %488 = vmatpush1.bf16.msra.mxu1 %v468_v20 }
 0x2fe   : > { %v423_v23 = vpop.permute.xlu1 %422  ;;  %v421_v8 = vpop.permute.xlu0 %420 }
 0x2ff   : > { %v424_v7 = vsel %vm265_vm3, %v421_v8, %v423_v23  ;;  %v425_v9 = vsel %vm265_vm3, %v423_v23, %v421_v8 }
 0x300   : > { %v456_v27 = vmul.f32 %v425_v9, %v1214_v29  ;;  %v457_v28 = vmul.f32 %v424_v7, %v1216_v30  ;;  %v458_v29 = vmul.f32 %v398_v56, %v1225_v36 }
 0x302   : > { %v429_v31 = vpop.permute.xlu1 %428  ;;  %v427_v32 = vpop.permute.xlu0 %426  ;;  %v471_v33 = vpack.c.bf16 %v457_v28, %v455_v24  ;;  %v470_v34 = vpack.c.bf16 %v456_v27, %v454_v10 }
 0x303   : > { %v430_v37 = vsel %vm272_vm4, %v427_v32, %v429_v31  ;;  %v431_v38 = vsel %vm272_vm4, %v429_v31, %v427_v32 }
 0x304   : > { %v460_v39 = vmul.f32 %v430_v37, %v1231_v41  ;;  %v461_v25 = vmul.f32 %v431_v38, %v1233_v42  ;;  %489 = vmatprep.subr.bf16.mxu1 %v471_v33 }
 0x305   : > { %490 = vmatpush1.bf16.msra.mxu1 %v470_v34 }
 0x306   : > { %v435_v30 = vpop.permute.xlu1 %434  ;;  %v433_v40 = vpop.permute.xlu0 %432  ;;  %v473_v43 = vpack.c.bf16 %v461_v25, %v459_v26  ;;  %v472_v44 = vpack.c.bf16 %v460_v39, %v458_v29 }
 0x307   : > { %v436_v45 = vsel %vm279_vm5, %v433_v40, %v435_v30  ;;  %v437_v46 = vsel %vm279_vm5, %v435_v30, %v433_v40 }
 0x308   : > { %491 = vmatprep.subr.bf16.mxu1 %v473_v43  ;;  %v462_v47 = vmul.f32 %v436_v45, %v1246_v57  ;;  %v463_v48 = vmul.f32 %v437_v46, %v1249_v58 }
 0x309   : > { %492 = vmatpush1.bf16.msra.mxu1 %v472_v44 }
 0x30a   : > { %v441_v41 = vpop.permute.xlu1 %440  ;;  %v439_v42 = vpop.permute.xlu0 %438 }
 0x30b   : > { %v442_v35 = vsel %vm286_vm6, %v439_v42, %v441_v41  ;;  %v443_v36 = vsel %vm286_vm6, %v441_v41, %v439_v42 }
 0x30c   : > { %v464_v49 = vmul.f32 %v442_v35, %v1255_v61  ;;  %v465_v50 = vmul.f32 %v443_v36, %v1257_v62 }
 0x30e   : > { %v447_v51 = vpop.permute.xlu1 %446  ;;  %v445_v52 = vpop.permute.xlu0 %444  ;;  %v475_v53 = vpack.c.bf16 %v465_v50, %v463_v48  ;;  %v474_v54 = vpack.c.bf16 %v464_v49, %v462_v47 }
 0x30f   : > { %v448_v55 = vsel %vm293_vm7, %v445_v52, %v447_v51  ;;  %v449_v56 = vsel %vm293_vm7, %v447_v51, %v445_v52 }
 0x310   : > { %v466_v59 = vmul.f32 %v448_v55, %v1268_v12  ;;  %v467_v57 = vmul.f32 %v449_v56, %v1270_v13  ;;  %493 = vmatprep.subr.bf16.mxu1 %v475_v53 }
 0x311   : > { %494 = vmatpush1.bf16.msra.mxu1 %v474_v54 }
 0x312   : > { %v476_v58 = vpack.c.bf16 %v466_v59, %v466_v59  ;;  %v477_v61 = vpack.c.bf16 %v467_v57, %v467_v57 }
 0x314   : > { %673 = vmatprep.subr.msk.bf16.mxu1 %vm328_vm8, %v477_v61  ;;  %v482_v62 = vsel %vm328_vm8, %v476_v58, 0 }
 0x315   : > { %496 = vmatpush1.bf16.msra.mxu1 %v482_v62 }
 0x318   : > { %674 = vmatmul.mubr.msk.bf16.vlgmr.msra.gmra.mrb[0].mxu1 %vm324_vm9, %v401_v60 }
 0x3eb   : > { %v521_v63 = vpop.f32.mrb[0].mxu1 }
 0x3ec   : > { %v523_v0 = vpop.f32.mrb[1].mxu1  ;;  %v528_v4 = vmul.f32 %v521_v63, %v521_v63 }
 0x3ed   : > { %v525_v1 = vpop.f32.mrb[2].mxu1  ;;  %v530_v2 = vadd.f32 %v523_v0, %v521_v63  ;;  %v529_v12 = vmul.f32 %v523_v0, %v523_v0 }
 0x3ee   : > { %v526_v3 = vpop.f32.mrb[3].mxu1 }
 0x3ef   : > { %531 = vadd.xlane.f32.xlu0 %v530_v2  ;;  %v533_v13 = vadd.f32 %v529_v12, %v528_v4 }
 0x3f1   : > { %534 = vadd.xlane.f32.xlu1 %v533_v13 }
 0x47c   : > { %v532_v5 = vpop.xlane.xlu0 %531 }
 0x47d   : > { %v536_v6 = vmul.f32 0.00390625, %v532_v5 }
 0x47e   : > { %v535_v11 = vpop.xlane.xlu1 %534 }
 0x47f   : > { %v538_v14 = vmul.f32 %v536_v6, %v536_v6  ;;  %v537_v15 = vmul.f32 0.00390625, %v535_v11  ;;  %v540_v18 = vsub.f32 %v521_v63, %v536_v6  ;;  %v541_v19 = vsub.f32 %v523_v0, %v536_v6 }
 0x481   : > { %v539_v16 = vsub.f32 %v537_v15, %v538_v14 }
 0x483   : > { %v542_v17 = vadd.f32 1e-05, %v539_v16 }
 0x485   : > { %764 = vrsqrt.f32 %v542_v17 }
 0x48f   : > { %v765_v20 = vpop.eup %764 }
 0x490   : > { %v544_v21 = vmul.f32 %v765_v20, %v540_v18  ;;  %v545_v22 = vmul.f32 %v765_v20, %v541_v19 }
 0x492   : > { %vm546_vm12 = vcmp.ge.f32.partialorder %v544_v21, 0.0  ;;  %vm547_vm13 = vcmp.ge.f32.partialorder %v545_v22, 0.0  ;;  %v548_v23 = vmul.f32 0.01, %v544_v21  ;;  %v549_v8 = vmul.f32 0.01, %v545_v22 }
 0x494   : > { %v550_v7 = vsel %vm546_vm12, %v544_v21, %v548_v23  ;;  %v551_v9 = vsel %vm547_vm13, %v545_v22, %v549_v8 }
 0x495   : > { %552 = vst [vmem:[%s215_s8] sm:$0xff] %v550_v7  ;;  %553 = vst [vmem:[%s215_s8 + $0x8] sm:$0xff] %v551_v9 }
 0x496   : > { %865 = shalt.err (!%p862_p2)
}
 0x497   : > { %s866_s21 = scalar_lea.hbm %s1356_s17, 256  ;;  %s870_s27 = scalar_lea.hbm %s1403_s3, 512 }
 0x498   : > { %p867_p13 = scmp.ne.s32.totalorder %s1356_s17, %s866_s21  ;;  %p871_p4 = scmp.lt.u32.totalorder %s1356_s17, %s1403_s3 }
 0x499   : > { %p872_p7 = scmp.lt.u32.totalorder %s870_s27, %s866_s21  ;;  %p874_p11 = scmp.lt.u32.totalorder %s866_s21, %s1356_s17 }
 0x49a   : > { %p868_p6 = pnand %p867_p13, %p1417_p0 }
 0x49b   : > { %p873_p8 = por %p872_p7, %p871_p4 }
 0x49c   : > { %p869_p10 = pneg %p868_p6 }
 0x49d   : > { %p875_p1 = por %p874_p11, %p873_p8 }
 0x49f   : > { %p876_p3 = pnand %p875_p1, %p869_p10 }
 0x4a1   : > { %879 = shalt.err (!%p876_p3)
}
 0x4a2   : > { %692 = dma.vmem_to_hbm [thread:$0]  (%p1417_p0), %s1358_s23, 256, %s1356_s17, %s555_s16  }
 0x4a3 PF: > { %s581_s4 = sand.u32 1, %s910_s12   ;;  %p1418_p5 = scmp.ne.s32.totalorder %s1408_s19, 0 }
 0x4a4   : > { %p1419_p9 = scmp.ge.s32.totalorder %s922_s15, 2  ;;  %s582_s5 = scalar_lea.sflag [#allocation4], %s581_s4 }
 0x4a6   : > { %p706_p12 = pnand %p1419_p9, %p1418_p5 }
 0x4a8   : > { %905 = dma.done.wait (!%p706_p12), %s582_s5, 256  }
 0x4a9   : > { %907 = vsyncadd (!%p706_p12), %s582_s5, 4294967040  ;;  %p17_p2 = scmp.ge.s32.totalorder %s1071_s6, 4   ;;  %s1420_s12 = smov %s914_s13 }
 0x4aa   : > { %s1421_s13 = smov %s918_s14  ;;  %s1422_s14 = smov %s1080_s9 }
 0x4ab   : > { %s1423_s15 = smov %s1071_s6  ;;  %19 = sbr.rel (!%p17_p2) target bundleno = 6 (0x6), region = 86 }
 0x4b2   :  { %587 = vsyncpa [#allocation3], 1 }
 0x4b3   :  { %589 = vsyncpa [#allocation3 + $0x1], 1 }
 0x4b4   :  { %590 = vsyncpa [#allocation6], 1 }
 0x4b5   :  { %591 = vsyncpa [#allocation4], 1 }
 0x4b6   :  { %593 = vsyncpa [#allocation4 + $0x1], 1 }

</bundles_post_ra>
